<compile_context>
chip_gen: v7x
topology: tpu7x:2x2x1
jax: 0.10.0
libtpu: 0.0.40
codegen_flags: <defaults>
</compile_context>

<pallas_src>
import functools

import numpy as np
import jax
import jax.numpy as jnp
from jax import lax
from jax.experimental import pallas as pl
from jax.experimental.pallas import tpu as pltpu

EPS = 1e-5


def block_kernel(col_ref, w_ref, gamma_ref, beta_ref, x_ref, linw_ref,
                 linb_ref, matchw_ref, mgamma_ref, mbeta_ref, out_ref, *,
                 N, HW, Cin, Cout, num_convs, match_dims):
    f32 = jnp.float32
    x2 = x_ref[...]                                   # (Cin, N*HW) f32, lane-dense

    # ---- AdaptiveAvgPool2d(1) + Linear1 + SiLU (per-sample gate) -------- #
    # Static per-sample lane slices (HW = 256, a multiple of 128 -> free views).
    pooled_t = jnp.concatenate(
        [jnp.mean(x2[:, n * HW:(n + 1) * HW], axis=1, keepdims=True)
         for n in range(N)], axis=1)                  # (Cin, N)
    a_t = jnp.dot(linw_ref[...], pooled_t,
                  preferred_element_type=f32) + linb_ref[...]   # (nc, N)
    a_t = a_t * jax.nn.sigmoid(a_t)                   # SiLU
    # Expand to a lane-dense scale matrix: scale[i, n*HW + p] = a[n, i].
    scale = jnp.concatenate(
        [jnp.broadcast_to(a_t[:, n:n + 1], (num_convs, HW)) for n in range(N)],
        axis=1)                                       # (nc, N*HW)

    # ---- identity / match_dimensions path -------------------------------- #
    if match_dims:
        # 1x1 conv (no bias) + BatchNorm (batch stats); kept f32 (tiny K=Cin).
        idp = jnp.dot(matchw_ref[...], x2, preferred_element_type=f32)  # (Cout, N*HW)
        mu = jnp.mean(idp, axis=1, keepdims=True)
        var = jnp.mean(idp * idp, axis=1, keepdims=True) - mu * mu
        s = mgamma_ref[...] * lax.rsqrt(var + EPS)
        acc = idp * s + (mbeta_ref[...] - mu * s)
    else:
        acc = x2                                      # Identity (Cin == Cout)

    # ---- all conv branches: ONE stacked bf16 MXU matmul, f32 accumulate -- #
    conv = jnp.dot(w_ref[...], col_ref[...],
                   preferred_element_type=f32)        # (nc*Cout, N*HW)
    # Fused training-mode BatchNorm: per (branch, channel) row, one-pass stats.
    mu = jnp.mean(conv, axis=1, keepdims=True)
    var = jnp.mean(conv * conv, axis=1, keepdims=True) - mu * mu
    s = gamma_ref[...] * lax.rsqrt(var + EPS)
    bn = conv * s + (beta_ref[...] - mu * s)
    bn = bn * jax.nn.sigmoid(bn)                      # SiLU

    # ---- gate each branch's Cout-row channel group and sum into output --- #
    for i in range(num_convs):                        # static unroll, nc is tiny
        acc = acc + bn[i * Cout:(i + 1) * Cout, :] * scale[i:i + 1, :]
    out_ref[...] = acc


def block_forward(x_nchw, params, *, num_convs, match_dims):
    (convw, convb, gamma, beta, linw, linb, matchw, mgamma, mbeta) = params
    del convb  # cancels exactly under training-mode BN (batch mean subtracted)
    N, Cin, H, W = x_nchw.shape
    Cout = gamma.shape[1]
    HW = H * W
    if not match_dims:
        assert Cin == Cout, "Identity path requires Cin == Cout"

    # ---- wrapper-side layout plumbing (XLA); all kernel inputs lane-dense --
    # im2col: col[t*Cin + c, n*HW + h*W + w] = xpad[n, c, kh+h, kw+w], t=kh*3+kw
    xpad = jnp.pad(x_nchw, ((0, 0), (0, 0), (1, 1), (1, 1)))
    taps = [xpad[:, :, kh:kh + H, kw:kw + W] for kh in range(3) for kw in range(3)]
    col = jnp.transpose(jnp.stack(taps, axis=0), (0, 2, 1, 3, 4))
    col = col.reshape(9 * Cin, N * HW).astype(jnp.bfloat16)        # bf16 MXU operand

    x2d = jnp.transpose(x_nchw, (1, 0, 2, 3)).reshape(Cin, N * HW)  # f32

    # Stacked conv weights: w_all[i*Cout + o, (kh*3+kw)*Cin + c] = convw[i,kh,kw,c,o]
    w_all = jnp.transpose(convw, (0, 4, 1, 2, 3))
    w_all = w_all.reshape(num_convs * Cout, 9 * Cin).astype(jnp.bfloat16)

    gamma_f = gamma.reshape(num_convs * Cout, 1)
    beta_f = beta.reshape(num_convs * Cout, 1)
    linw_t = linw.T                                    # (nc, Cin)
    linb_t = linb.reshape(num_convs, 1)                # (nc, 1)
    matchw_t = matchw.T                                # (Cout, Cin)
    mgamma_t = mgamma.reshape(Cout, 1)
    mbeta_t = mbeta.reshape(Cout, 1)

    kernel = functools.partial(block_kernel, N=N, HW=HW, Cin=Cin, Cout=Cout,
                               num_convs=num_convs, match_dims=match_dims)

    # Single invocation (no grid): every input is a whole-array VMEM block.
    vmem = pl.BlockSpec(memory_space=pltpu.MemorySpace.VMEM)
    out2 = pl.pallas_call(
        kernel,
        out_shape=jax.ShapeDtypeStruct((Cout, N * HW), jnp.float32),
        in_specs=[vmem] * 10,
        out_specs=vmem,
    )(col, w_all, gamma_f, beta_f, x2d, linw_t, linb_t, matchw_t, mgamma_t, mbeta_t)

    # out2 is lane-dense (Cout, N*HW); final NCHW layout is a tiny XLA transpose.
    return jnp.transpose(out2.reshape(Cout, N, H, W), (1, 0, 2, 3))


# ---------------- deterministic parameter init ----------------
def init_params(key, num_convs, Cin, Cout):
    ks = jax.random.split(key, 9)
    convw = 0.1 * jax.random.normal(ks[0], (num_convs, 3, 3, Cin, Cout), jnp.float32)
    convb = 0.1 * jax.random.normal(ks[1], (num_convs, Cout), jnp.float32)
    gamma = 1.0 + 0.1 * jax.random.normal(ks[2], (num_convs, Cout), jnp.float32)
    beta = 0.1 * jax.random.normal(ks[3], (num_convs, Cout), jnp.float32)
    linw = 0.1 * jax.random.normal(ks[4], (Cin, num_convs), jnp.float32)
    linb = 0.1 * jax.random.normal(ks[5], (1, num_convs), jnp.float32)
    matchw = 0.1 * jax.random.normal(ks[6], (Cin, Cout), jnp.float32)
    mgamma = 1.0 + 0.1 * jax.random.normal(ks[7], (1, Cout), jnp.float32)
    mbeta = 0.1 * jax.random.normal(ks[8], (1, Cout), jnp.float32)
    return (convw, convb, gamma, beta, linw, linb, matchw, mgamma, mbeta)


# ---------------- pure-JAX (XLA conv) reference ----------------
def ref_block(x, params, *, num_convs):
    (convw, convb, gamma, beta, linw, linb, matchw, mgamma, mbeta) = params
    N, Cin, H, W = x.shape
    Cout = convb.shape[1]
    dn = ('NCHW', 'OIHW', 'NCHW')

    pooled = jnp.mean(x, axis=(2, 3))                  # (N, Cin)
    a = pooled @ linw + linb[0]
    a = a * jax.nn.sigmoid(a)

    w1 = jnp.transpose(matchw, (1, 0)).reshape(Cout, Cin, 1, 1)
    idp = lax.conv_general_dilated(x, w1, (1, 1), 'SAME', dimension_numbers=dn)
    mu = jnp.mean(idp, axis=(0, 2, 3), keepdims=True)
    var = jnp.mean((idp - mu) ** 2, axis=(0, 2, 3), keepdims=True)
    acc = ((idp - mu) / jnp.sqrt(var + EPS)
           * mgamma[0][None, :, None, None] + mbeta[0][None, :, None, None])

    for i in range(num_convs):
        w = jnp.transpose(convw[i], (3, 2, 0, 1))      # (Cout, Cin, 3, 3)
        c = lax.conv_general_dilated(x, w, (1, 1), 'SAME', dimension_numbers=dn)
        c = c + convb[i][None, :, None, None]          # cancels under training BN
        mu = jnp.mean(c, axis=(0, 2, 3), keepdims=True)
        var = jnp.mean((c - mu) ** 2, axis=(0, 2, 3), keepdims=True)
        bn = ((c - mu) / jnp.sqrt(var + EPS)
              * gamma[i][None, :, None, None] + beta[i][None, :, None, None])
        bn = bn * jax.nn.sigmoid(bn)
        acc = acc + bn * a[:, i][:, None, None, None]
    return acc


if __name__ == "__main__":
    N, Cin, Cout, H, W = 2, 4, 8, 16, 16
    num_convs = 3

    key = jax.random.PRNGKey(0)
    kx, kp = jax.random.split(key)
    x = jax.random.normal(kx, (N, Cin, H, W), jnp.float32)
    params = init_params(kp, num_convs, Cin, Cout)

    fwd = jax.jit(functools.partial(block_forward, num_convs=num_convs,
                                    match_dims=(Cin != Cout)))
    out = jax.block_until_ready(fwd(x, params))

    ref = ref_block(x, params, num_convs=num_convs)
    # bf16 MXU operands (f32 accumulation) on the gated conv branches keep the
    # error ~1e-3; 5e-3 leaves margin while still validating BN/SiLU/gate math.
    np.testing.assert_allclose(np.asarray(out), np.asarray(ref), rtol=5e-3, atol=5e-3)

    print("KERNEL_OK")
</pallas_src>

<mosaic_0001>
module attributes {stable_mosaic.version = 11 : i64} {
  func.func @block_kernel(%arg0: memref<36x512xbf16, #tpu.memory_space<vmem>>, %arg1: memref<24x36xbf16, #tpu.memory_space<vmem>>, %arg2: memref<24x1xf32, #tpu.memory_space<vmem>>, %arg3: memref<24x1xf32, #tpu.memory_space<vmem>>, %arg4: memref<4x512xf32, #tpu.memory_space<vmem>>, %arg5: memref<3x4xf32, #tpu.memory_space<vmem>>, %arg6: memref<3x1xf32, #tpu.memory_space<vmem>>, %arg7: memref<8x4xf32, #tpu.memory_space<vmem>>, %arg8: memref<8x1xf32, #tpu.memory_space<vmem>>, %arg9: memref<8x1xf32, #tpu.memory_space<vmem>>, %arg10: memref<8x512xf32, #tpu.memory_space<vmem>>) attributes {dimension_semantics = [], scalar_prefetch = 0 : i64, scratch_operands = 0 : i64, tpu.core_type = #tpu.core_type<tc>} {
    %c0 = arith.constant 0 : index
    %c0_0 = arith.constant 0 : index
    %0 = vector.load %arg4[%c0, %c0_0] : memref<4x512xf32, #tpu.memory_space<vmem>>, vector<4x512xf32>
    %1 = vector.extract_strided_slice %0 {offsets = [0, 0], sizes = [4, 256], strides = [1, 1]} : vector<4x512xf32> to vector<4x256xf32>
    %cst = arith.constant dense<0.000000e+00> : vector<4xf32>
    %2 = vector.multi_reduction <add>, %1, %cst [1] : vector<4x256xf32> to vector<4xf32>
    %3 = vector.shape_cast %2 : vector<4xf32> to vector<4x1xf32>
    %cst_1 = arith.constant 2.560000e+02 : f32
    %4 = vector.broadcast %cst_1 : f32 to vector<4x1xf32>
    %5 = arith.divf %3, %4 : vector<4x1xf32>
    %6 = vector.extract_strided_slice %0 {offsets = [0, 256], sizes = [4, 256], strides = [1, 1]} : vector<4x512xf32> to vector<4x256xf32>
    %cst_2 = arith.constant dense<0.000000e+00> : vector<4xf32>
    %7 = vector.multi_reduction <add>, %6, %cst_2 [1] : vector<4x256xf32> to vector<4xf32>
    %8 = vector.shape_cast %7 : vector<4xf32> to vector<4x1xf32>
    %cst_3 = arith.constant 2.560000e+02 : f32
    %9 = vector.broadcast %cst_3 : f32 to vector<4x1xf32>
    %10 = arith.divf %8, %9 : vector<4x1xf32>
    %11 = tpu.concatenate %5, %10 in 1 : vector<4x1xf32>, vector<4x1xf32> -> vector<4x2xf32>
    %c0_4 = arith.constant 0 : index
    %c0_5 = arith.constant 0 : index
    %12 = vector.load %arg5[%c0_4, %c0_5] : memref<3x4xf32, #tpu.memory_space<vmem>>, vector<3x4xf32>
    %cst_6 = arith.constant dense<0.000000e+00> : vector<3x2xf32>
    %13 = tpu.matmul %12, %11, %cst_6 {dimension_numbers = #tpu.dot_dimension_numbers<[1], [0], [0], [1], [0, 0, 1, 1], [], []>} : vector<3x4xf32>, vector<4x2xf32>, vector<3x2xf32> -> vector<3x2xf32>
    %c0_7 = arith.constant 0 : index
    %c0_8 = arith.constant 0 : index
    %14 = vector.load %arg6[%c0_7, %c0_8] : memref<3x1xf32, #tpu.memory_space<vmem>>, vector<3x1xf32>
    %15 = vector.broadcast %14 : vector<3x1xf32> to vector<3x2xf32>
    %16 = arith.addf %13, %15 : vector<3x2xf32>
    %17 = arith.negf %16 : vector<3x2xf32>
    %18 = math.exp %17 : vector<3x2xf32>
    %cst_9 = arith.constant 1.000000e+00 : f32
    %19 = vector.broadcast %cst_9 : f32 to vector<3x2xf32>
    %20 = arith.addf %19, %18 : vector<3x2xf32>
    %21 = arith.divf %19, %20 : vector<3x2xf32>
    %22 = arith.mulf %16, %21 : vector<3x2xf32>
    %23 = vector.extract_strided_slice %22 {offsets = [0, 0], sizes = [3, 1], strides = [1, 1]} : vector<3x2xf32> to vector<3x1xf32>
    %24 = vector.shape_cast %23 : vector<3x1xf32> to vector<3x1xf32>
    %25 = vector.broadcast %24 : vector<3x1xf32> to vector<3x256xf32>
    %26 = vector.extract_strided_slice %22 {offsets = [0, 1], sizes = [3, 1], strides = [1, 1]} : vector<3x2xf32> to vector<3x1xf32>
    %27 = vector.shape_cast %26 : vector<3x1xf32> to vector<3x1xf32>
    %28 = vector.broadcast %27 : vector<3x1xf32> to vector<3x256xf32>
    %29 = tpu.concatenate %25, %28 in 1 : vector<3x256xf32>, vector<3x256xf32> -> vector<3x512xf32>
    %c0_10 = arith.constant 0 : index
    %c0_11 = arith.constant 0 : index
    %30 = vector.load %arg7[%c0_10, %c0_11] : memref<8x4xf32, #tpu.memory_space<vmem>>, vector<8x4xf32>
    %cst_12 = arith.constant dense<0.000000e+00> : vector<8x512xf32>
    %31 = tpu.matmul %30, %0, %cst_12 {dimension_numbers = #tpu.dot_dimension_numbers<[1], [0], [0], [1], [0, 0, 1, 1], [], []>} : vector<8x4xf32>, vector<4x512xf32>, vector<8x512xf32> -> vector<8x512xf32>
    %cst_13 = arith.constant dense<0.000000e+00> : vector<8xf32>
    %32 = vector.multi_reduction <add>, %31, %cst_13 [1] : vector<8x512xf32> to vector<8xf32>
    %33 = vector.shape_cast %32 : vector<8xf32> to vector<8x1xf32>
    %cst_14 = arith.constant 5.120000e+02 : f32
    %34 = vector.broadcast %cst_14 : f32 to vector<8x1xf32>
    %35 = arith.divf %33, %34 : vector<8x1xf32>
    %36 = arith.mulf %31, %31 : vector<8x512xf32>
    %cst_15 = arith.constant dense<0.000000e+00> : vector<8xf32>
    %37 = vector.multi_reduction <add>, %36, %cst_15 [1] : vector<8x512xf32> to vector<8xf32>
    %38 = vector.shape_cast %37 : vector<8xf32> to vector<8x1xf32>
    %cst_16 = arith.constant 5.120000e+02 : f32
    %39 = vector.broadcast %cst_16 : f32 to vector<8x1xf32>
    %40 = arith.divf %38, %39 : vector<8x1xf32>
    %41 = arith.mulf %35, %35 : vector<8x1xf32>
    %42 = arith.subf %40, %41 : vector<8x1xf32>
    %c0_17 = arith.constant 0 : index
    %c0_18 = arith.constant 0 : index
    %43 = vector.load %arg8[%c0_17, %c0_18] : memref<8x1xf32, #tpu.memory_space<vmem>>, vector<8x1xf32>
    %cst_19 = arith.constant 9.99999974E-6 : f32
    %44 = vector.broadcast %cst_19 : f32 to vector<8x1xf32>
    %45 = arith.addf %42, %44 : vector<8x1xf32>
    %46 = math.rsqrt %45 : vector<8x1xf32>
    %47 = arith.mulf %43, %46 : vector<8x1xf32>
    %48 = vector.broadcast %47 : vector<8x1xf32> to vector<8x512xf32>
    %49 = arith.mulf %31, %48 : vector<8x512xf32>
    %c0_20 = arith.constant 0 : index
    %c0_21 = arith.constant 0 : index
    %50 = vector.load %arg9[%c0_20, %c0_21] : memref<8x1xf32, #tpu.memory_space<vmem>>, vector<8x1xf32>
    %51 = arith.mulf %35, %47 : vector<8x1xf32>
    %52 = arith.subf %50, %51 : vector<8x1xf32>
    %53 = vector.broadcast %52 : vector<8x1xf32> to vector<8x512xf32>
    %54 = arith.addf %49, %53 : vector<8x512xf32>
    %c0_22 = arith.constant 0 : index
    %c0_23 = arith.constant 0 : index
    %55 = vector.load %arg1[%c0_22, %c0_23] : memref<24x36xbf16, #tpu.memory_space<vmem>>, vector<24x36xbf16>
    %c0_24 = arith.constant 0 : index
    %c0_25 = arith.constant 0 : index
    %56 = vector.load %arg0[%c0_24, %c0_25] : memref<36x512xbf16, #tpu.memory_space<vmem>>, vector<36x512xbf16>
    %cst_26 = arith.constant dense<0.000000e+00> : vector<24x512xf32>
    %57 = tpu.matmul %55, %56, %cst_26 {dimension_numbers = #tpu.dot_dimension_numbers<[1], [0], [0], [1], [0, 0, 1, 1], [], []>} : vector<24x36xbf16>, vector<36x512xbf16>, vector<24x512xf32> -> vector<24x512xf32>
    %cst_27 = arith.constant dense<0.000000e+00> : vector<24xf32>
    %58 = vector.multi_reduction <add>, %57, %cst_27 [1] : vector<24x512xf32> to vector<24xf32>
    %59 = vector.shape_cast %58 : vector<24xf32> to vector<24x1xf32>
    %cst_28 = arith.constant 5.120000e+02 : f32
    %60 = vector.broadcast %cst_28 : f32 to vector<24x1xf32>
    %61 = arith.divf %59, %60 : vector<24x1xf32>
    %62 = arith.mulf %57, %57 : vector<24x512xf32>
    %cst_29 = arith.constant dense<0.000000e+00> : vector<24xf32>
    %63 = vector.multi_reduction <add>, %62, %cst_29 [1] : vector<24x512xf32> to vector<24xf32>
    %64 = vector.shape_cast %63 : vector<24xf32> to vector<24x1xf32>
    %cst_30 = arith.constant 5.120000e+02 : f32
    %65 = vector.broadcast %cst_30 : f32 to vector<24x1xf32>
    %66 = arith.divf %64, %65 : vector<24x1xf32>
    %67 = arith.mulf %61, %61 : vector<24x1xf32>
    %68 = arith.subf %66, %67 : vector<24x1xf32>
    %c0_31 = arith.constant 0 : index
    %c0_32 = arith.constant 0 : index
    %69 = vector.load %arg2[%c0_31, %c0_32] : memref<24x1xf32, #tpu.memory_space<vmem>>, vector<24x1xf32>
    %cst_33 = arith.constant 9.99999974E-6 : f32
    %70 = vector.broadcast %cst_33 : f32 to vector<24x1xf32>
    %71 = arith.addf %68, %70 : vector<24x1xf32>
    %72 = math.rsqrt %71 : vector<24x1xf32>
    %73 = arith.mulf %69, %72 : vector<24x1xf32>
    %74 = vector.broadcast %73 : vector<24x1xf32> to vector<24x512xf32>
    %75 = arith.mulf %57, %74 : vector<24x512xf32>
    %c0_34 = arith.constant 0 : index
    %c0_35 = arith.constant 0 : index
    %76 = vector.load %arg3[%c0_34, %c0_35] : memref<24x1xf32, #tpu.memory_space<vmem>>, vector<24x1xf32>
    %77 = arith.mulf %61, %73 : vector<24x1xf32>
    %78 = arith.subf %76, %77 : vector<24x1xf32>
    %79 = vector.broadcast %78 : vector<24x1xf32> to vector<24x512xf32>
    %80 = arith.addf %75, %79 : vector<24x512xf32>
    %81 = arith.negf %80 : vector<24x512xf32>
    %82 = math.exp %81 : vector<24x512xf32>
    %cst_36 = arith.constant 1.000000e+00 : f32
    %83 = vector.broadcast %cst_36 : f32 to vector<24x512xf32>
    %84 = arith.addf %83, %82 : vector<24x512xf32>
    %85 = arith.divf %83, %84 : vector<24x512xf32>
    %86 = arith.mulf %80, %85 : vector<24x512xf32>
    %87 = vector.extract_strided_slice %86 {offsets = [0, 0], sizes = [8, 512], strides = [1, 1]} : vector<24x512xf32> to vector<8x512xf32>
    %88 = vector.extract_strided_slice %29 {offsets = [0, 0], sizes = [1, 512], strides = [1, 1]} : vector<3x512xf32> to vector<1x512xf32>
    %89 = vector.broadcast %88 : vector<1x512xf32> to vector<8x512xf32>
    %90 = arith.mulf %87, %89 : vector<8x512xf32>
    %91 = arith.addf %54, %90 : vector<8x512xf32>
    %92 = vector.extract_strided_slice %86 {offsets = [8, 0], sizes = [8, 512], strides = [1, 1]} : vector<24x512xf32> to vector<8x512xf32>
    %93 = vector.extract_strided_slice %29 {offsets = [1, 0], sizes = [1, 512], strides = [1, 1]} : vector<3x512xf32> to vector<1x512xf32>
    %94 = vector.broadcast %93 : vector<1x512xf32> to vector<8x512xf32>
    %95 = arith.mulf %92, %94 : vector<8x512xf32>
    %96 = arith.addf %91, %95 : vector<8x512xf32>
    %97 = vector.extract_strided_slice %86 {offsets = [16, 0], sizes = [8, 512], strides = [1, 1]} : vector<24x512xf32> to vector<8x512xf32>
    %98 = vector.extract_strided_slice %29 {offsets = [2, 0], sizes = [1, 512], strides = [1, 1]} : vector<3x512xf32> to vector<1x512xf32>
    %99 = vector.broadcast %98 : vector<1x512xf32> to vector<8x512xf32>
    %100 = arith.mulf %97, %99 : vector<8x512xf32>
    %101 = arith.addf %96, %100 : vector<8x512xf32>
    %c0_37 = arith.constant 0 : index
    %c0_38 = arith.constant 0 : index
    %102 = vector.load %arg10[%c0_37, %c0_38] : memref<8x512xf32, #tpu.memory_space<vmem>>, vector<8x512xf32>
    tpu.vector_store %arg10[%c0_37, %c0_38], %101 {strides = array<i32>} : memref<8x512xf32, #tpu.memory_space<vmem>>, vector<8x512xf32>,
    return
  }
}

</mosaic_0001>

<bundles_post_ra>
// kernel: block_forward.1
= control target key start
LH: loop header
LB: loop body
LE: loop exit
PB: predicated region body
PF: predicated region fallthrough
CT: control target
= control target key end

     0   :  { %vm41_vm0 = vcmask 1043456   ;;  %v956_v12 = vmov 0.0   ;;  %vm67_vm1 = vcmask 31744   ;;  %vm957_vm2 = vmmov 0   ;;  %s1291_s4 = inlined_call_operand.vmem [shape: f32[4,512], index: 4, kind: input, shape index: {}]   ;;  %s1292_s0 = inlined_call_operand.vmem [shape: bf16[36,512], index: 0, kind: input, shape index: {}]   ;;  %s1293_s7 = inlined_call_operand.vmem [shape: f32[8,4], index: 7, kind: input, shape index: {}]   ;;  %s1294_s1 = inlined_call_operand.vmem [shape: bf16[24,36], index: 1, kind: input, shape index: {}]   ;;  %s1295_s5 = inlined_call_operand.vmem [shape: f32[3,4], index: 5, kind: input, shape index: {}]   ;;  %s1296_s6 = inlined_call_operand.vmem [shape: f32[3,1], index: 6, kind: input, shape index: {}]   ;;  %s1297_s2 = inlined_call_operand.vmem [shape: f32[24,1], index: 2, kind: input, shape index: {}]   ;;  %s1298_s3 = inlined_call_operand.vmem [shape: f32[24,1], index: 3, kind: input, shape index: {}]   ;;  %s1299_s8 = inlined_call_operand.vmem [shape: f32[8,1], index: 8, kind: input, shape index: {}]   ;;  %s1300_s9 = inlined_call_operand.vmem [shape: f32[8,1], index: 9, kind: input, shape index: {}]   ;;  %s1301_s10 = inlined_call_operand.vmem [shape: f32[8,512], index: 10, kind: output, shape index: {}]  }
   0x1   :  { %v36_v0 = vld [vmem:[%s1291_s4] sm:$0xff]  ;;  %v37_v1 = vld [vmem:[%s1291_s4 + $0x8] sm:$0xff]  ;;  %863 = vmatprep.subr.mxu0 %v956_v12  ;;  %236 = vmatprep.mubr.f32.mxu1 %v956_v12  ;;  %vm436_vm3 = vcmask 1041408   ;;  %v958_v21 = vmov 0   ;;  %vm429_vm4 = vcmask 293888   ;;  %vm58_vm5 = vcmask 7168  }
   0x2   :  { %v39_v2 = vcombine.high %v36_v0, %v36_v0  ;;  %v42_v3 = vsel %vm41_vm0, %v36_v0, 0.0  ;;  %v50_v4 = vcombine.high %v37_v1, %v37_v1  ;;  %v52_v6 = vsel %vm41_vm0, %v37_v1, 0.0  ;;  %v880_v10 = vld [vmem:[%s1292_s0 + $0x4] ss:$16 sps:$4 sm:$0xff]   ;;  %v878_v11 = vld [vmem:[%s1292_s0] ss:$16 sps:$4 sm:$0xff]   ;;  %865 = vmatprep.mubr.msk.f32.mxu0 %vm957_vm2, %v956_v12  ;;  %872 = vset.pattern.permute.xlu0 %v958_v21 }
   0x3   :  { %v160_v13 = vld [vmem:[%s1293_s7] sm:$0xff]  ;;  %873 = vset.pattern.permute.xlu1 %v958_v21  ;;  %v895_v22 = vld [vmem:[%s1294_s1 + $0x8] ss:$0 sps:$4 sm:$0xff]   ;;  %v886_v29 = vld [vmem:[%s1292_s0 + $0xc] ss:$16 sps:$4 sm:$0xff]  }
   0x4   :  { %v43_v5 = vsel %vm41_vm0, %v39_v2, 0.0  ;;  %v53_v7 = vsel %vm41_vm0, %v50_v4, 0.0  ;;  %823 = vmatprep.subr.msk.mxu1 %vm41_vm0, %v39_v2  ;;  %v883_v14 = vld [vmem:[%s1292_s0 + $0x24] ss:$16 sps:$4 sm:$0xff]   ;;  %v881_v15 = vld [vmem:[%s1292_s0 + $0x20] ss:$16 sps:$4 sm:$0xff]  }
   0x5   :  { %v44_v8 = vadd.f32 %v43_v5, %v42_v3  ;;  %824 = vmatpush1.msk.msra.mxu1 %vm41_vm0, %v36_v0  ;;  %v54_v9 = vadd.f32 %v53_v7, %v52_v6  ;;  %v369_v16 = vld [vmem:[%s1292_s0 + $0x40] sm:$0x33]  ;;  %v884_v30 = vld [vmem:[%s1292_s0 + $0x8] ss:$16 sps:$4 sm:$0xff]   ;;  %v891_v31 = vld [vmem:[%s1292_s0 + $0x2c] ss:$16 sps:$4 sm:$0xff]  }
   0x6   :  { %449 = vmatprep.subr.bf16.mxu1 %v880_v10  ;;  %825 = vmatmul.mubr.msk.f32.vlgmr.msra.gmra.mrb[0].mxu1 %vm67_vm1, %v160_v13  ;;  %v840_v17 = vcombine.high %v369_v16, %v369_v16  ;;  %v839_v18 = vcombine.low %v369_v16, %v369_v16  ;;  %v892_v20 = vld [vmem:[%s1294_s1] sm:$0xff]   ;;  %v370_v32 = vld [vmem:[%s1292_s0 + $0x48] sm:$0x33] }
   0x7   :  { %45 = vadd.xlane.f32.xlu0 %v44_v8  ;;  %450 = vmatpush1.bf16.msra.mxu1 %v878_v11  ;;  %v60_v27 = vld [vmem:[%s1295_s5] sm:$0x7]  ;;  %v889_v33 = vld [vmem:[%s1292_s0 + $0x28] ss:$16 sps:$4 sm:$0xff]   ;;  %v842_v34 = vcombine.high %v370_v32, %v370_v32  ;;  %v841_v35 = vcombine.low %v370_v32, %v370_v32 }
   0x8   :  { %451 = vmatprep.subr.bf16.mxu1 %v883_v14  ;;  %v438_v19 = vsel %vm436_vm3, %v839_v18, 0  ;;  %481 = vmatprep.mubr.bf16.mxu1 %v958_v21 }
   0x9   :  { %v444_v36 = vsel %vm436_vm3, %v841_v35, 0 }
   0xb   :  { %55 = vadd.xlane.f32.xlu0 %v54_v9  ;;  %452 = vmatpush1.bf16.msra.mxu1 %v881_v15 }
   0xc   :  { %843 = vmatprep.subr.msk.bf16.mxu1 %vm436_vm3, %v840_v17 }
   0xf   :  { %454 = vmatpush1.bf16.msra.mxu1 %v438_v19 }
  0x12   :  { %844 = vmatmul.mubr.msk.bf16.vlgmr.msra.gmra.mrb[4].mxu1 %vm429_vm4, %v892_v20 }
  0x13   :  { %491 = vmatprep.mubr.bf16.mxu1 %v958_v21 }
  0x1a   :  { %845 = vmatmul.mubr.msk.bf16.gmra.mrb[8].mxu1 %vm429_vm4, %v895_v22 }
  0x94   :  { %v46_v23 = vpop.xlane.xlu0 %45 }
  0x95   :  { %v48_v25 = vmul.f32 0.00390625, %v46_v23 }
  0x98   :  { %v56_v24 = vpop.xlane.xlu0 %55 }
  0x99   :  { %v57_v26 = vmul.f32 0.00390625, %v56_v24 }
  0x9b   :  { %v59_v28 = vsel %vm58_vm5, %v48_v25, %v57_v26 }
  0x9c   :  { %864 = vmatpush3.msk.msra.mxu0 %vm41_vm0, %v59_v28 }
  0x9d   :  { %866 = vmatmul.mubr.msk.f32.vlgmr.msra.gmra.mrb[0].mxu0 %vm67_vm1, %v60_v27  ;;  %826 = vmatprep.subr.msk.mxu0 %vm41_vm0, %v50_v4 }
  0x9e   :  { %827 = vmatpush1.msk.msra.mxu0 %vm41_vm0, %v37_v1  ;;  %307 = vmatprep.mubr.f32.mxu0 %v956_v12 }
  0x9f   :  { %500 = vmatprep.subr.bf16.mxu0 %v886_v29 }
  0xa1   :  { %828 = vmatmul.mubr.msk.f32.vlgmr.msra.gmra.mrb[2].mxu0 %vm67_vm1, %v160_v13 }
  0xa2   :  { %501 = vmatpush1.bf16.msra.mxu0 %v884_v30  ;;  %532 = vmatprep.mubr.bf16.mxu0 %v958_v21 }
  0xa3   :  { %502 = vmatprep.subr.bf16.mxu0 %v891_v31 }
  0xa6   :  { %503 = vmatpush1.bf16.msra.mxu0 %v889_v33 }
  0xa7   :  { %846 = vmatprep.subr.msk.bf16.mxu0 %vm436_vm3, %v842_v34 }
  0xaa   :  { %505 = vmatpush1.bf16.msra.mxu0 %v444_v36  ;;  %v61_v36 = vld [vmem:[%s1296_s6] sm:$0x7] }
  0xad   :  { %847 = vmatmul.mubr.msk.bf16.vlgmr.msra.gmra.mrb[4].mxu0 %vm429_vm4, %v892_v20 }
  0xae   :  { %542 = vmatprep.mubr.bf16.mxu0 %v958_v21 }
  0xb5   :  { %848 = vmatmul.mubr.msk.bf16.gmra.mrb[8].mxu0 %vm429_vm4, %v895_v22 }
  0xd9   :  { %v1089_v37 = vpop.f32.mrb[0].mxu1 }
  0xda   :  { %v321_v38 = vmul.f32 %v1089_v37, %v1089_v37  ;;  %v1093_v39 = vpop.f32.mrb[1].mxu1 }
  0xdb   :  { %v314_v40 = vadd.f32 %v1093_v39, %v1089_v37  ;;  %v322_v41 = vmul.f32 %v1093_v39, %v1093_v39 }
  0xdd   :  { %v325_v42 = vadd.f32 %v322_v41, %v321_v38 }
  0xe5   :  { %v1099_v43 = vpop.f32.mrb[4].mxu1 }
  0xe6   :  { %v1101_v44 = vpop.f32.mrb[5].mxu1  ;;  %v569_v45 = vmul.f32 %v1099_v43, %v1099_v43 }
  0xe7   :  { %v551_v46 = vadd.f32 %v1101_v44, %v1099_v43  ;;  %v570_v47 = vmul.f32 %v1101_v44, %v1101_v44  ;;  %v1109_v48 = vpop.f32.mrb[6].mxu1 }
  0xe8   :  { %v573_v49 = vmul.f32 %v1109_v48, %v1109_v48  ;;  %v1113_v50 = vpop.f32.mrb[7].mxu1 }
  0xe9   :  { %v556_v51 = vadd.f32 %v1113_v50, %v1109_v48  ;;  %v574_v52 = vmul.f32 %v1113_v50, %v1113_v50  ;;  %v581_v53 = vadd.f32 %v570_v47, %v569_v45 }
  0xeb   :  { %v586_v54 = vadd.f32 %v574_v52, %v573_v49 }
  0xed   :  { %v1119_v55 = vpop.f32.mrb[8].mxu1 }
  0xee   :  { %v1121_v56 = vpop.f32.mrb[9].mxu1  ;;  %v577_v57 = vmul.f32 %v1119_v55, %v1119_v55 }
  0xef   :  { %v561_v58 = vadd.f32 %v1121_v56, %v1119_v55  ;;  %v578_v59 = vmul.f32 %v1121_v56, %v1121_v56  ;;  %v497_v60 = vpop.f32.mrb[10].mxu1 }
  0xf0   :  { %v498_v61 = vpop.f32.mrb[11].mxu1 }
  0xf1   :  { %v591_v62 = vadd.f32 %v578_v59, %v577_v57 }
 0x170   :  { %v1129_v63 = vpop.f32.mrb[0].mxu0 }
 0x171   :  { %v867_v0 = vpop.f32.mrb[1].mxu0 }
 0x174   :  { %v1131_v1 = vpop.f32.mrb[2].mxu0 }
 0x175   :  { %v323_v2 = vmul.f32 %v1131_v1, %v1131_v1  ;;  %v1135_v3 = vpop.f32.mrb[3].mxu0  ;;  %v315_v4 = vadd.f32 %v314_v40, %v1131_v1 }
 0x176   :  { %v324_v5 = vmul.f32 %v1135_v3, %v1135_v3 }
 0x177   :  { %v316_v6 = vadd.f32 %v315_v4, %v1135_v3  ;;  %v326_v7 = vadd.f32 %v325_v42, %v323_v2 }
 0x179   :  { %v327_v8 = vadd.f32 %v326_v7, %v324_v5 }
 0x180   :  { %v1141_v9 = vpop.f32.mrb[4].mxu0 }
 0x181   :  { %v571_v10 = vmul.f32 %v1141_v9, %v1141_v9  ;;  %v1145_v11 = vpop.f32.mrb[5].mxu0  ;;  %v552_v12 = vadd.f32 %v551_v46, %v1141_v9 }
 0x182   :  { %v1148_v13 = vpop.f32.mrb[6].mxu0  ;;  %v572_v14 = vmul.f32 %v1145_v11, %v1145_v11 }
 0x183   :  { %v575_v15 = vmul.f32 %v1148_v13, %v1148_v13  ;;  %v1154_v16 = vpop.f32.mrb[7].mxu0  ;;  %v553_v17 = vadd.f32 %v552_v12, %v1145_v11  ;;  %v582_v18 = vadd.f32 %v581_v53, %v571_v10  ;;  %v557_v19 = vadd.f32 %v556_v51, %v1148_v13  ;;  %v605_v12 = vld [vmem:[%s1297_s2] sm:$0xff] }
 0x184   :  { %v576_v20 = vmul.f32 %v1154_v16, %v1154_v16 }
 0x185   :  { %554 = vadd.xlane.f32.xlu1 %v553_v17  ;;  %v583_v22 = vadd.f32 %v582_v18, %v572_v14  ;;  %v558_v23 = vadd.f32 %v557_v19, %v1154_v16  ;;  %v587_v24 = vadd.f32 %v586_v54, %v575_v15 }
 0x187   :  { %584 = vadd.xlane.f32.xlu0 %v583_v22  ;;  %v588_v25 = vadd.f32 %v587_v24, %v576_v20  ;;  %v606_v20 = vld [vmem:[%s1297_s2 + $0x8] sm:$0xff] }
 0x188   :  { %v1161_v26 = vpop.f32.mrb[8].mxu0 }
 0x189   :  { %v579_v27 = vmul.f32 %v1161_v26, %v1161_v26  ;;  %559 = vadd.xlane.f32.xlu1 %v558_v23  ;;  %v1165_v28 = vpop.f32.mrb[9].mxu0  ;;  %v562_v29 = vadd.f32 %v561_v58, %v1161_v26 }
 0x18a   :  { %v548_v30 = vpop.f32.mrb[10].mxu0  ;;  %v580_v31 = vmul.f32 %v1165_v28, %v1165_v28 }
 0x18b   :  { %589 = vadd.xlane.f32.xlu0 %v588_v25  ;;  %v563_v32 = vadd.f32 %v562_v29, %v1165_v28  ;;  %v549_v33 = vpop.f32.mrb[11].mxu0  ;;  %v592_v34 = vadd.f32 %v591_v62, %v579_v27  ;;  %v644_v27 = vld [vmem:[%s1298_s3] sm:$0xff] }
 0x18c   :  { %v607_v33 = vld [vmem:[%s1297_s2 + $0x10] sm:$0xff] }
 0x18d   :  { %564 = vadd.xlane.f32.xlu1 %v563_v32  ;;  %v593_v35 = vadd.f32 %v592_v34, %v580_v31  ;;  %v645_v32 = vld [vmem:[%s1298_s3 + $0x8] sm:$0xff] }
 0x191   :  { %594 = vadd.xlane.f32.xlu1 %v593_v35 }
 0x195   :  { %317 = vadd.xlane.f32.xlu1 %v316_v6 }
 0x199   :  { %328 = vadd.xlane.f32.xlu1 %v327_v8 }
 0x1a1   :  { %64 = vperm.xlu0 %872, %v61_v36  }
 0x212   :  { %v555_v38 = vpop.xlane.xlu1 %554 }
 0x213   :  { %v566_v40 = vmul.f32 0.001953125, %v555_v38 }
 0x214   :  { %v585_v41 = vpop.xlane.xlu0 %584 }
 0x215   :  { %v599_v42 = vmul.f32 %v566_v40, %v566_v40  ;;  %v596_v45 = vmul.f32 0.001953125, %v585_v41  ;;  %v646_v41 = vld [vmem:[%s1298_s3 + $0x10] sm:$0xff] }
 0x216   :  { %v560_v46 = vpop.xlane.xlu1 %559 }
 0x217   :  { %v602_v47 = vsub.f32 %v596_v45, %v599_v42  ;;  %v567_v49 = vmul.f32 0.001953125, %v560_v46  ;;  %v333_v45 = vld [vmem:[%s1299_s8] sm:$0xff] }
 0x218   :  { %v590_v51 = vpop.xlane.xlu0 %589 }
 0x219   :  { %v608_v52 = vadd.f32 1e-05, %v602_v47  ;;  %v600_v53 = vmul.f32 %v567_v49, %v567_v49  ;;  %v597_v54 = vmul.f32 0.001953125, %v590_v51 }
 0x21a   :  { %v565_v57 = vpop.xlane.xlu1 %564 }
 0x21b   :  { %896 = vrsqrt.f32 %v608_v52  ;;  %v603_v58 = vsub.f32 %v597_v54, %v600_v53  ;;  %v568_v59 = vmul.f32 0.001953125, %v565_v57  ;;  %v959_v52 = vmov 1   ;;  %v346_v54 = vld [vmem:[%s1300_s9] sm:$0xff] }
 0x21d   :  { %v609_v60 = vadd.f32 1e-05, %v603_v58  ;;  %v601_v61 = vmul.f32 %v568_v59, %v568_v59 }
 0x21e   :  { %v595_v62 = vpop.xlane.xlu1 %594 }
 0x21f   :  { %898 = vrsqrt.f32 %v609_v60  ;;  %v598_v0 = vmul.f32 0.001953125, %v595_v62 }
 0x220   :  { %v65_v2 = vpop.permute.xlu0 %64 }
 0x221   :  { %v604_v4 = vsub.f32 %v598_v0, %v601_v61  ;;  %v141_v5 = vadd.f32 %v1129_v63, %v65_v2 }
 0x222   :  { %v318_v6 = vpop.xlane.xlu1 %317 }
 0x223   :  { %v610_v7 = vadd.f32 1e-05, %v604_v4  ;;  %v822_v8 = vmul.f32 -1.442695, %v141_v5  ;;  %v320_v10 = vmul.f32 0.001953125, %v318_v6 }
 0x225   :  { %v897_v14 = vpop.eup %896  ;;  %900 = vrsqrt.f32 %v610_v7  ;;  %v331_v18 = vmul.f32 %v320_v10, %v320_v10 }
 0x226   :  { %902 = vpow2.f32 %v822_v8  ;;  %v329_v15 = vpop.xlane.xlu1 %328  ;;  %v614_v17 = vmul.f32 %v897_v14, %v605_v12 }
 0x227   :  { %v330_v19 = vmul.f32 0.001953125, %v329_v15 }
 0x228   :  { %619 = vperm.xlu1 %873, %v614_v17   ;;  %v647_v24 = vmul.f32 %v614_v17, %v566_v40 }
 0x229   :  { %v899_v63 = vpop.eup %898  ;;  %v332_v22 = vsub.f32 %v330_v19, %v331_v18 }
 0x22a   :  { %v615_v23 = vmul.f32 %v899_v63, %v606_v20  ;;  %v650_v29 = vsub.f32 %v644_v27, %v647_v24 }
 0x22b   :  { %v334_v25 = vadd.f32 1e-05, %v332_v22 }
 0x22c   :  { %624 = vperm.xlu1 %873, %v615_v23   ;;  %v648_v30 = vmul.f32 %v615_v23, %v567_v49 }
 0x22d   :  { %904 = vrsqrt.f32 %v334_v25 }
 0x22e   :  { %v651_v36 = vsub.f32 %v645_v32, %v648_v30 }
 0x22f   :  { %v901_v31 = vpop.eup %900 }
 0x230   :  { %v903_v34 = vpop.eup %902  ;;  %655 = vperm.xlu1 %873, %v650_v29   ;;  %v616_v38 = vmul.f32 %v901_v31, %v607_v33 }
 0x231   :  { %v147_v35 = vadd.f32 1.0, %v903_v34  ;;  %v764_v34 = vlaneseq }
 0x232   :  { %v649_v40 = vmul.f32 %v616_v38, %v568_v59 }
 0x233   :  { %906 = vrcp.f32 %v147_v35 }
 0x234   :  { %660 = vperm.xlu1 %873, %v651_v36   ;;  %v652_v46 = vsub.f32 %v646_v41, %v649_v40 }
 0x237   :  { %v905_v42 = vpop.eup %904 }
 0x238   :  { %629 = vperm.xlu1 %873, %v616_v38   ;;  %v336_v47 = vmul.f32 %v905_v42, %v333_v45 }
 0x23a   :  { %v347_v53 = vmul.f32 %v336_v47, %v320_v10 }
 0x23c   :  { %665 = vperm.xlu1 %873, %v652_v46   ;;  %v348_v57 = vsub.f32 %v346_v54, %v347_v53 }
 0x23d   :  { %v907_v49 = vpop.eup %906 }
 0x23e   :  { %v150_v51 = vmul.f32 %v907_v49, %v141_v5 }
 0x240   :  { %153 = vperm.xlu0 %872, %v150_v51   ;;  %874 = vset.pattern.permute.xlu1 %v959_v52 }
 0x241   :  { %157 = vperm.xlu1 %874, %v150_v51   ;;  %v1247_v51 = vshrl.u32 %v764_v34, 7 }
 0x244   :  { %339 = vperm.xlu0 %872, %v336_v47  }
 0x245   :  { %875 = vset.pattern.permute.xlu1 %v958_v21 }
 0x246   :  { %351 = vperm.xlu1 %875, %v348_v57  }
 0x2a7   :  { %v620_v58 = vpop.permute.xlu1 %619 }
 0x2a8   :  { %v632_v60 = vmul.f32 %v620_v58, %v1099_v43  ;;  %v633_v61 = vmul.f32 %v620_v58, %v1101_v44  ;;  %v634_v62 = vmul.f32 %v620_v58, %v1141_v9  ;;  %v635_v0 = vmul.f32 %v620_v58, %v1145_v11 }
 0x2ab   :  { %v625_v59 = vpop.permute.xlu1 %624 }
 0x2ac   :  { %v636_v21 = vmul.f32 %v625_v59, %v1109_v48  ;;  %v637_v8 = vmul.f32 %v625_v59, %v1113_v50  ;;  %v638_v43 = vmul.f32 %v625_v59, %v1148_v13  ;;  %v639_v10 = vmul.f32 %v625_v59, %v1154_v16 }
 0x2af   :  { %v656_v2 = vpop.permute.xlu1 %655 }
 0x2b0   :  { %v1204_v4 = vadd.f32 %v656_v2, %v632_v60  ;;  %v1206_v5 = vadd.f32 %v656_v2, %v633_v61  ;;  %v1208_v6 = vadd.f32 %v656_v2, %v634_v62  ;;  %v1210_v7 = vadd.f32 %v656_v2, %v635_v0 }
 0x2b1   :  { %v766_v61 = vsub.s32 0, %v1247_v51 }
 0x2b2   :  { %v849_v44 = vmul.f32 -1.442695, %v1204_v4  ;;  %v850_v9 = vmul.f32 -1.442695, %v1206_v5  ;;  %v851_v11 = vmul.f32 -1.442695, %v1208_v6 }
 0x2b3   :  { %v852_v12 = vmul.f32 -1.442695, %v1210_v7  ;;  %v661_v14 = vpop.permute.xlu1 %660 }
 0x2b4   :  { %908 = vpow2.f32 %v849_v44  ;;  %v1220_v15 = vadd.f32 %v661_v14, %v636_v21  ;;  %v1222_v17 = vadd.f32 %v661_v14, %v637_v8  ;;  %v1224_v48 = vadd.f32 %v661_v14, %v638_v43 }
 0x2b5   :  { %910 = vpow2.f32 %v850_v9  ;;  %v1226_v50 = vadd.f32 %v661_v14, %v639_v10  ;;  %v782_v8 = vsub.s32 1, %v1247_v51 }
 0x2b6   :  { %912 = vpow2.f32 %v851_v11  ;;  %v853_v13 = vmul.f32 -1.442695, %v1220_v15  ;;  %v854_v18 = vmul.f32 -1.442695, %v1222_v17  ;;  %v855_v16 = vmul.f32 -1.442695, %v1224_v48 }
 0x2b7   :  { %914 = vpow2.f32 %v852_v12  ;;  %v856_v19 = vmul.f32 -1.442695, %v1226_v50  ;;  %v630_v20 = vpop.permute.xlu1 %629 }
 0x2b8   :  { %916 = vpow2.f32 %v853_v13  ;;  %v640_v63 = vmul.f32 %v630_v20, %v1119_v55  ;;  %v641_v30 = vmul.f32 %v630_v20, %v1121_v56  ;;  %v642_v33 = vmul.f32 %v630_v20, %v1161_v26 }
 0x2b9   :  { %918 = vpow2.f32 %v854_v18  ;;  %v643_v55 = vmul.f32 %v630_v20, %v1165_v28 }
 0x2ba   :  { %920 = vpow2.f32 %v855_v16 }
 0x2bb   :  { %922 = vpow2.f32 %v856_v19  ;;  %v666_v22 = vpop.permute.xlu1 %665 }
 0x2bc   :  { %v1233_v23 = vadd.f32 %v666_v22, %v640_v63  ;;  %v1239_v38 = vadd.f32 %v666_v22, %v641_v30  ;;  %v1243_v45 = vadd.f32 %v666_v22, %v642_v33  ;;  %v1245_v26 = vadd.f32 %v666_v22, %v643_v55 }
 0x2be   :  { %v909_v24 = vpop.eup %908  ;;  %v857_v25 = vmul.f32 -1.442695, %v1233_v23  ;;  %v858_v53 = vmul.f32 -1.442695, %v1239_v38  ;;  %v859_v58 = vmul.f32 -1.442695, %v1243_v45 }
 0x2bf   :  { %v911_v27 = vpop.eup %910  ;;  %v716_v29 = vadd.f32 1.0, %v909_v24  ;;  %v1241_v40 = vpop.permute.xlu0 %153  ;;  %v860_v59 = vmul.f32 -1.442695, %v1245_v26 }
 0x2c0   :  { %v913_v31 = vpop.eup %912  ;;  %v717_v32 = vadd.f32 1.0, %v911_v27  ;;  %924 = vpow2.f32 %v857_v25  ;;  %v1250_v54 = vpop.permute.xlu1 %157  ;;  %v767_v10 = vrot.slane %v1241_v40, %v766_v61 }
 0x2c1   :  { %v915_v35 = vpop.eup %914  ;;  %v718_v36 = vadd.f32 1.0, %v913_v31  ;;  %926 = vrcp.f32 %v716_v29  ;;  %v787_v55 = vrot.slane %v1250_v54, %v782_v8 }
 0x2c2   :  { %v917_v41 = vpop.eup %916  ;;  %v719_v42 = vadd.f32 1.0, %v915_v35  ;;  %928 = vrcp.f32 %v717_v32 }
 0x2c3   :  { %v919_v56 = vpop.eup %918  ;;  %930 = vrcp.f32 %v718_v36  ;;  %v720_v46 = vadd.f32 1.0, %v917_v41  ;;  %v340_v60 = vpop.permute.xlu0 %339 }
 0x2c4   :  { %v921_v47 = vpop.eup %920  ;;  %932 = vrcp.f32 %v719_v42  ;;  %v721_v49 = vadd.f32 1.0, %v919_v56  ;;  %v342_v0 = vmul.f32 %v340_v60, %v1089_v37  ;;  %v343_v43 = vmul.f32 %v340_v60, %v1093_v39 }
 0x2c5   :  { %v923_v28 = vpop.eup %922  ;;  %v722_v52 = vadd.f32 1.0, %v921_v47  ;;  %934 = vrcp.f32 %v720_v46  ;;  %v352_v44 = vpop.permute.xlu1 %351  ;;  %v344_v12 = vmul.f32 %v340_v60, %v1131_v1  ;;  %v345_v37 = vmul.f32 %v340_v60, %v1135_v3 }
 0x2c6   :  { %v723_v57 = vadd.f32 1.0, %v923_v28  ;;  %936 = vrcp.f32 %v721_v49  ;;  %v771_v39 = vrot.slane %v1250_v54, %v766_v61  ;;  %v354_v20 = vadd.f32 %v352_v44, %v342_v0 }
 0x2c7   :  { %938 = vrcp.f32 %v722_v52  ;;  %v355_v1 = vadd.f32 %v352_v44, %v343_v43  ;;  %v356_v29 = vadd.f32 %v352_v44, %v344_v12  ;;  %v357_v32 = vadd.f32 %v352_v44, %v345_v37 }
 0x2c8   :  { %940 = vrcp.f32 %v723_v57  ;;  %v798_v49 = vsub.s32 2, %v1247_v51 }
 0x2c9   :  { %942 = vpow2.f32 %v858_v53 }
 0x2ca   :  { %v925_v62 = vpop.eup %924  ;;  %944 = vpow2.f32 %v859_v58 }
 0x2cb   :  { %v927_v2 = vpop.eup %926  ;;  %946 = vpow2.f32 %v860_v59  ;;  %v724_v21 = vadd.f32 1.0, %v925_v62  ;;  %v799_v62 = vrot.slane %v1241_v40, %v798_v49 }
 0x2cc   :  { %v929_v9 = vpop.eup %928  ;;  %v752_v11 = vmul.f32 %v927_v2, %v1204_v4  ;;  %v783_v4 = vrot.slane %v1241_v40, %v782_v8 }
 0x2cd   :  { %v931_v14 = vpop.eup %930  ;;  %948 = vrcp.f32 %v724_v21  ;;  %v753_v13 = vmul.f32 %v929_v9, %v1206_v5  ;;  %v803_v9 = vrot.slane %v1250_v54, %v798_v49 }
 0x2ce   :  { %v933_v18 = vpop.eup %932  ;;  %v772_v16 = vmul.f32 %v767_v10, %v752_v11  ;;  %v754_v19 = vmul.f32 %v931_v14, %v1208_v6 }
 0x2cf   :  { %v935_v63 = vpop.eup %934  ;;  %v773_v22 = vmul.f32 %v767_v10, %v753_v13  ;;  %v755_v24 = vmul.f32 %v933_v18, %v1210_v7 }
 0x2d0   :  { %v937_v25 = vpop.eup %936  ;;  %v756_v27 = vmul.f32 %v935_v63, %v1220_v15  ;;  %v774_v5 = vmul.f32 %v771_v39, %v754_v19  ;;  %v776_v3 = vadd.f32 %v772_v16, %v354_v20 }
 0x2d1   :  { %v939_v30 = vpop.eup %938  ;;  %v757_v31 = vmul.f32 %v937_v25, %v1222_v17  ;;  %v775_v6 = vmul.f32 %v771_v39, %v755_v24  ;;  %v777_v33 = vadd.f32 %v773_v22, %v355_v1 }
 0x2d2   :  { %v941_v34 = vpop.eup %940  ;;  %v788_v35 = vmul.f32 %v783_v4, %v756_v27  ;;  %v758_v36 = vmul.f32 %v939_v30, %v1224_v48  ;;  %v778_v7 = vadd.f32 %v774_v5, %v356_v29 }
 0x2d3   :  { %v943_v41 = vpop.eup %942  ;;  %v789_v42 = vmul.f32 %v783_v4, %v757_v31  ;;  %v759_v15 = vmul.f32 %v941_v34, %v1226_v50  ;;  %v779_v56 = vadd.f32 %v775_v6, %v357_v32 }
 0x2d4   :  { %v945_v46 = vpop.eup %944  ;;  %v725_v47 = vadd.f32 1.0, %v943_v41  ;;  %v790_v17 = vmul.f32 %v787_v55, %v758_v36  ;;  %v792_v28 = vadd.f32 %v788_v35, %v776_v3 }
 0x2d5   :  { %v947_v52 = vpop.eup %946  ;;  %v726_v53 = vadd.f32 1.0, %v945_v46  ;;  %v791_v57 = vmul.f32 %v787_v55, %v759_v15  ;;  %v793_v58 = vadd.f32 %v789_v42, %v777_v33 }
 0x2d6   :  { %v727_v59 = vadd.f32 1.0, %v947_v52  ;;  %950 = vrcp.f32 %v725_v47  ;;  %v794_v48 = vadd.f32 %v790_v17, %v778_v7 }
 0x2d7   :  { %v949_v60 = vpop.eup %948  ;;  %952 = vrcp.f32 %v726_v53  ;;  %v795_v61 = vadd.f32 %v791_v57, %v779_v56 }
 0x2d8   :  { %954 = vrcp.f32 %v727_v59  ;;  %v760_v50 = vmul.f32 %v949_v60, %v1233_v23 }
 0x2da   :  { %v804_v0 = vmul.f32 %v799_v62, %v760_v50 }
 0x2dc   :  { %v808_v2 = vadd.f32 %v804_v0, %v792_v28 }
 0x2de   :  { %812 = vst [vmem:[%s1301_s10] sm:$0xff] %v808_v2 }
 0x2e0   :  { %v951_v51 = vpop.eup %950 }
 0x2e1   :  { %v953_v21 = vpop.eup %952  ;;  %v761_v8 = vmul.f32 %v951_v51, %v1239_v38 }
 0x2e2   :  { %v955_v43 = vpop.eup %954  ;;  %v762_v44 = vmul.f32 %v953_v21, %v1243_v45 }
 0x2e3   :  { %v805_v11 = vmul.f32 %v799_v62, %v761_v8  ;;  %v763_v23 = vmul.f32 %v955_v43, %v1245_v26 }
 0x2e4   :  { %v806_v10 = vmul.f32 %v803_v9, %v762_v44 }
 0x2e5   :  { %v807_v40 = vmul.f32 %v803_v9, %v763_v23  ;;  %v809_v12 = vadd.f32 %v805_v11, %v793_v58 }
 0x2e6   :  { %v810_v14 = vadd.f32 %v806_v10, %v794_v48 }
 0x2e7   :  { %v811_v13 = vadd.f32 %v807_v40, %v795_v61  ;;  %813 = vst [vmem:[%s1301_s10 + $0x8] sm:$0xff] %v809_v12 }
 0x2e8   :  { %814 = vst [vmem:[%s1301_s10 + $0x10] sm:$0xff] %v810_v14 }
 0x2e9   :  { %815 = vst [vmem:[%s1301_s10 + $0x18] sm:$0xff] %v811_v13 }

</bundles_post_ra>
